<compile_context>
chip_gen: v5e
topology: v5e:2x2
jax: 0.10.0
libtpu: 0.0.40
codegen_flags: <defaults>
</compile_context>

<pallas_src>
from typing import NamedTuple

import jax
import jax.numpy as jnp
from jax import lax
from jax.experimental import pallas as pl
from jax.experimental.pallas import tpu as pltpu

_TM_MAX = 64  # max sublane rows per grid step (64 * 128 = 8192 poses/step)


def _cdiv(a, b):
    return -(-a // b)


def _round_up(a, b):
    return _cdiv(a, b) * b


def _num_tensorcores() -> int:
    """Best-effort TensorCore count per chip (v7x = 2). Falls back to 1."""
    try:
        info = pltpu.get_tpu_info()
        for attr in ("num_cores", "num_tensorcores", "core_count",
                     "num_cores_per_chip", "cores_per_chip"):
            v = getattr(info, attr, None)
            if v:
                return int(v)
    except Exception:
        pass
    return 1


def _choose_tm(nb: int, cores: int) -> int:
    """Sublane-block size (multiple of 8) for `nb` 128-pose sublane rows.

    Single-TC chips (v5e/v6e): one big block, no forced split (per-step
    pipeline overhead ~0.35us dominates tiny steps). Multi-TC (v7x): keep a
    few large 'parallel' steps so both TensorCores get substantial work.
    VMEM is never the constraint here (<1.5 MB double-buffered at tm=64)."""
    nb8 = max(8, _round_up(nb, 8))
    if cores > 1 and nb8 > 8:
        tm = max(8, _round_up(_cdiv(nb8, 2 * cores), 8))
    else:
        tm = nb8
    return min(_TM_MAX, tm)


# ---------------------------------------------------------------------------
# Kernels
# ---------------------------------------------------------------------------

def _pose_rows(p_ref):
    # p_ref: (7, tm, 128) — rows qx, qy, qz, qw, tx, ty, tz.
    # Each plane is a dense (tm, 128) f32 tile -> full-vreg VPU work.
    x, y, z, w = p_ref[0], p_ref[1], p_ref[2], p_ref[3]
    tx, ty, tz = p_ref[4], p_ref[5], p_ref[6]

    # F.normalize: q / max(||q||, 1e-12) == q * rsqrt(max(||q||^2, 1e-24))
    sq = x * x + y * y + z * z + w * w
    inv = lax.rsqrt(jnp.maximum(sq, 1e-24))      # single EUP op
    x, y, z, w = x * inv, y * inv, z * inv, w * inv

    xx, yy, zz = x * x, y * y, z * z
    xy, xz, yz = x * y, x * z, y * z
    xw, yw, zw = x * w, y * w, z * w

    # roma.unitquat_to_rotmat (XYZW convention), joined with t (row-major 3x4).
    return (1.0 - 2.0 * (yy + zz), 2.0 * (xy - zw), 2.0 * (xz + yw), tx,
            2.0 * (xy + zw), 1.0 - 2.0 * (xx + zz), 2.0 * (yz - xw), ty,
            2.0 * (xz - yw), 2.0 * (yz + xw), 1.0 - 2.0 * (xx + yy), tz)


def _pose_kernel_top(p_ref, o_ref):
    # o_ref: (12, tm, 128) — the 12 non-constant pose entries, one dense plane
    # each (full-vreg unmasked stores).
    for k, v in enumerate(_pose_rows(p_ref)):
        o_ref[k] = v


def _pose_kernel_full(p_ref, o_ref):
    # o_ref: (16, tm, 128) — full row-major 4x4 (constant [0,0,0,1] row
    # included) so the (M,4,4) wrapper is a single transpose+reshape.
    rows = _pose_rows(p_ref)
    for k, v in enumerate(rows):
        o_ref[k] = v
    zero = jnp.zeros_like(rows[0])
    o_ref[12] = zero
    o_ref[13] = zero
    o_ref[14] = zero
    o_ref[15] = jnp.ones_like(rows[0])


# ---------------------------------------------------------------------------
# Packing / wrappers
# ---------------------------------------------------------------------------

class PackedPoseTable(NamedTuple):
    rows: jax.Array    # (N, 7) row-major [qx qy qz qw tx ty tz] — gather copy
    planes: jax.Array  # (7, NBP, 128) sublane-dense feature planes (0-padded)
    n: int
    tm: int


def _rows_to_planes(rows: jax.Array, tm: int):
    """(M, 7) row-major -> (7, NBP, 128) sublane-dense planes, NBP % tm == 0."""
    m = rows.shape[0]
    nbp = _round_up(max(_cdiv(m, 128), 1), tm)
    mp = nbp * 128
    if mp != m:
        rows = jnp.pad(rows, ((0, mp - m), (0, 0)))   # zero columns are safe
    planes = jnp.transpose(rows.reshape(nbp, 128, 7), (2, 0, 1))
    return planes, nbp


def pack_pose_table(q, t) -> PackedPoseTable:
    """One-time packing (module __init__ analogue)."""
    q = jnp.asarray(q, jnp.float32)
    t = jnp.asarray(t, jnp.float32)
    assert q.ndim == 2 and q.shape[1] == 4 and t.shape == (q.shape[0], 3)
    n = q.shape[0]
    rows = jnp.concatenate([q, t], axis=1)            # (N, 7) row-major
    tm = _choose_tm(_cdiv(n, 128), _num_tensorcores())
    planes, _ = _rows_to_planes(rows, tm)             # padded once, up front
    return PackedPoseTable(rows=rows, planes=planes, n=n, tm=tm)


def _run_pose_kernel(planes: jax.Array, tm: int, n_rows: int) -> jax.Array:
    c, nbp, lanes = planes.shape
    assert c == 7 and lanes == 128 and nbp % tm == 0
    kernel = _pose_kernel_top if n_rows == 12 else _pose_kernel_full
    return pl.pallas_call(
        kernel,
        out_shape=jax.ShapeDtypeStruct((n_rows, nbp, 128), jnp.float32),
        grid=(nbp // tm,),
        in_specs=[pl.BlockSpec((7, tm, 128), lambda i: (0, i, 0))],
        out_specs=pl.BlockSpec((n_rows, tm, 128), lambda i: (0, i, 0)),
        compiler_params=pltpu.CompilerParams(
            dimension_semantics=("parallel",)),
    )(planes)


def _planes_for(table: PackedPoseTable, indices):
    if indices is None:
        return table.planes, table.n, table.tm
    indices = jnp.asarray(indices)
    assert indices.ndim <= 1
    idx = indices.reshape(-1)
    # Row (sublane-direction) gather on the (N, 7) copy — the cheap gather
    # direction on TPU; never gather along the lane axis of the planes.
    # TODO(synk): jnp.take clamps out-of-range indices; PyTorch asserts.
    rows = jnp.take(table.rows, idx, axis=0)          # (M, 7)
    m = rows.shape[0]
    tm = _choose_tm(_cdiv(m, 128), _num_tensorcores())
    planes, _ = _rows_to_planes(rows, tm)
    return planes, m, tm


def pose_table_forward_packed(table: PackedPoseTable, indices=None):
    """Fast path: (12, M) feature-major pose rows (constant [0,0,0,1] omitted).

    Hot consumers that tolerate lane padding should consume the kernel's
    (12, NBP, 128) output directly and skip the final column slice."""
    planes, m, tm = _planes_for(table, indices)
    out = _run_pose_kernel(planes, tm, n_rows=12)     # (12, NBP, 128)
    flat = out.reshape(12, -1)                        # contiguous -> free
    return flat if flat.shape[1] == m else flat[:, :m]


def pose_table_forward(table: PackedPoseTable, indices=None):
    """PyTorch-layout output: (M, 4, 4) float32 pose matrices."""
    planes, m, tm = _planes_for(table, indices)
    out = _run_pose_kernel(planes, tm, n_rows=16)     # (16, NBP, 128)
    pose = jnp.transpose(out, (1, 2, 0)).reshape(-1, 4, 4)
    return pose if pose.shape[0] == m else pose[:m]


# ---------------------------------------------------------------------------
# Pure-JAX reference mirroring the PyTorch module
# ---------------------------------------------------------------------------

def _reference(q, t, indices=None):
    if indices is not None:
        q = q[indices]
        t = t[indices]
    norm = jnp.linalg.norm(q, axis=-1, keepdims=True)
    qn = q / jnp.maximum(norm, 1e-12)
    x, y, z, w = qn[..., 0], qn[..., 1], qn[..., 2], qn[..., 3]
    r = jnp.stack([
        jnp.stack([1 - 2 * (y * y + z * z), 2 * (x * y - z * w), 2 * (x * z + y * w)], -1),
        jnp.stack([2 * (x * y + z * w), 1 - 2 * (x * x + z * z), 2 * (y * z - x * w)], -1),
        jnp.stack([2 * (x * z - y * w), 2 * (y * z + x * w), 1 - 2 * (x * x + y * y)], -1),
    ], -2)
    m = q.shape[0]
    pose = jnp.zeros((m, 4, 4), jnp.float32)
    pose = pose.at[:, :3, :3].set(r)
    pose = pose.at[:, :3, 3].set(t)
    pose = pose.at[:, 3, 3].set(1.0)
    return pose


if __name__ == "__main__":
    key = jax.random.PRNGKey(0)
    k_q, k_t, k_idx = jax.random.split(key, 3)

    N = 256  # number of poses in the table
    # forward() re-normalizes q, so raw gaussians are valid synthetic params.
    q_param = jax.random.normal(k_q, (N, 4), dtype=jnp.float32)
    t_param = jax.random.normal(k_t, (N, 3), dtype=jnp.float32)

    table = pack_pose_table(q_param, t_param)  # done once, like __init__

    # Path 1: indices=None (full table)
    pose_all = pose_table_forward(table, None)
    jax.block_until_ready(pose_all)

    # Path 2: gathered indices with M not a multiple of 128 (exercises padding)
    indices = jax.random.randint(k_idx, (100,), 0, N, dtype=jnp.int32)
    pose_idx = pose_table_forward(table, indices)
    jax.block_until_ready(pose_idx)

    # Fast feature-major output (what hot downstream consumers should take)
    flat_idx = pose_table_forward_packed(table, indices)
    jax.block_until_ready(flat_idx)

    # Verify against pure-JAX reference
    ref_all = _reference(q_param, t_param, None)
    ref_idx = _reference(q_param, t_param, indices)

    assert pose_all.shape == (N, 4, 4) and pose_all.dtype == jnp.float32
    assert pose_idx.shape == (100, 4, 4) and pose_idx.dtype == jnp.float32
    assert flat_idx.shape == (12, 100) and flat_idx.dtype == jnp.float32
    assert jnp.allclose(pose_all, ref_all, atol=1e-4, rtol=1e-4)
    assert jnp.allclose(pose_idx, ref_idx, atol=1e-4, rtol=1e-4)
    assert jnp.allclose(flat_idx.T.reshape(100, 3, 4), ref_idx[:, :3, :],
                        atol=1e-4, rtol=1e-4)

    print("KERNEL_OK")
</pallas_src>

<mosaic_0001>
module attributes {stable_mosaic.version = 11 : i64} {
  func.func @_pose_kernel_full(%arg0: i32, %arg1: memref<7x8x128xf32, #tpu.memory_space<vmem>>, %arg2: memref<16x8x128xf32, #tpu.memory_space<vmem>>) attributes {dimension_semantics = [#tpu.dimension_semantics<parallel>], iteration_bounds = array<i64: 1>, scalar_prefetch = 0 : i64, scratch_operands = 0 : i64, tpu.core_type = #tpu.core_type<tc>, window_params = [{transform_indices = @transform_0, window_bounds = array<i64: 7, 8, 128>}, {transform_indices = @transform_1, window_bounds = array<i64: 16, 8, 128>}]} {
    %c0 = arith.constant 0 : index
    %c0_0 = arith.constant 0 : index
    %c0_1 = arith.constant 0 : index
    %0 = vector.load %arg1[%c0, %c0_0, %c0_1] : memref<7x8x128xf32, #tpu.memory_space<vmem>>, vector<1x8x128xf32>
    %1 = vector.shape_cast %0 : vector<1x8x128xf32> to vector<8x128xf32>
    %c1 = arith.constant 1 : index
    %c0_2 = arith.constant 0 : index
    %c0_3 = arith.constant 0 : index
    %2 = vector.load %arg1[%c1, %c0_2, %c0_3] : memref<7x8x128xf32, #tpu.memory_space<vmem>>, vector<1x8x128xf32>
    %3 = vector.shape_cast %2 : vector<1x8x128xf32> to vector<8x128xf32>
    %c2 = arith.constant 2 : index
    %c0_4 = arith.constant 0 : index
    %c0_5 = arith.constant 0 : index
    %4 = vector.load %arg1[%c2, %c0_4, %c0_5] : memref<7x8x128xf32, #tpu.memory_space<vmem>>, vector<1x8x128xf32>
    %5 = vector.shape_cast %4 : vector<1x8x128xf32> to vector<8x128xf32>
    %c3 = arith.constant 3 : index
    %c0_6 = arith.constant 0 : index
    %c0_7 = arith.constant 0 : index
    %6 = vector.load %arg1[%c3, %c0_6, %c0_7] : memref<7x8x128xf32, #tpu.memory_space<vmem>>, vector<1x8x128xf32>
    %7 = vector.shape_cast %6 : vector<1x8x128xf32> to vector<8x128xf32>
    %c4 = arith.constant 4 : index
    %c0_8 = arith.constant 0 : index
    %c0_9 = arith.constant 0 : index
    %8 = vector.load %arg1[%c4, %c0_8, %c0_9] : memref<7x8x128xf32, #tpu.memory_space<vmem>>, vector<1x8x128xf32>
    %9 = vector.shape_cast %8 : vector<1x8x128xf32> to vector<8x128xf32>
    %c5 = arith.constant 5 : index
    %c0_10 = arith.constant 0 : index
    %c0_11 = arith.constant 0 : index
    %10 = vector.load %arg1[%c5, %c0_10, %c0_11] : memref<7x8x128xf32, #tpu.memory_space<vmem>>, vector<1x8x128xf32>
    %11 = vector.shape_cast %10 : vector<1x8x128xf32> to vector<8x128xf32>
    %c6 = arith.constant 6 : index
    %c0_12 = arith.constant 0 : index
    %c0_13 = arith.constant 0 : index
    %12 = vector.load %arg1[%c6, %c0_12, %c0_13] : memref<7x8x128xf32, #tpu.memory_space<vmem>>, vector<1x8x128xf32>
    %13 = vector.shape_cast %12 : vector<1x8x128xf32> to vector<8x128xf32>
    %14 = arith.mulf %1, %1 : vector<8x128xf32>
    %15 = arith.mulf %3, %3 : vector<8x128xf32>
    %16 = arith.addf %14, %15 : vector<8x128xf32>
    %17 = arith.mulf %5, %5 : vector<8x128xf32>
    %18 = arith.addf %16, %17 : vector<8x128xf32>
    %19 = arith.mulf %7, %7 : vector<8x128xf32>
    %20 = arith.addf %18, %19 : vector<8x128xf32>
    %cst = arith.constant 1.000000e-24 : f32
    %21 = vector.broadcast %cst : f32 to vector<8x128xf32>
    %22 = arith.maximumf %20, %21 : vector<8x128xf32>
    %23 = math.rsqrt %22 : vector<8x128xf32>
    %24 = arith.mulf %1, %23 : vector<8x128xf32>
    %25 = arith.mulf %3, %23 : vector<8x128xf32>
    %26 = arith.mulf %5, %23 : vector<8x128xf32>
    %27 = arith.mulf %7, %23 : vector<8x128xf32>
    %28 = arith.mulf %24, %24 : vector<8x128xf32>
    %29 = arith.mulf %25, %25 : vector<8x128xf32>
    %30 = arith.mulf %26, %26 : vector<8x128xf32>
    %31 = arith.mulf %24, %25 : vector<8x128xf32>
    %32 = arith.mulf %24, %26 : vector<8x128xf32>
    %33 = arith.mulf %25, %26 : vector<8x128xf32>
    %34 = arith.mulf %24, %27 : vector<8x128xf32>
    %35 = arith.mulf %25, %27 : vector<8x128xf32>
    %36 = arith.mulf %26, %27 : vector<8x128xf32>
    %37 = arith.addf %29, %30 : vector<8x128xf32>
    %cst_14 = arith.constant 2.000000e+00 : f32
    %38 = vector.broadcast %cst_14 : f32 to vector<8x128xf32>
    %39 = arith.mulf %38, %37 : vector<8x128xf32>
    %cst_15 = arith.constant 1.000000e+00 : f32
    %40 = vector.broadcast %cst_15 : f32 to vector<8x128xf32>
    %41 = arith.subf %40, %39 : vector<8x128xf32>
    %42 = arith.subf %31, %36 : vector<8x128xf32>
    %cst_16 = arith.constant 2.000000e+00 : f32
    %43 = vector.broadcast %cst_16 : f32 to vector<8x128xf32>
    %44 = arith.mulf %43, %42 : vector<8x128xf32>
    %45 = arith.addf %32, %35 : vector<8x128xf32>
    %cst_17 = arith.constant 2.000000e+00 : f32
    %46 = vector.broadcast %cst_17 : f32 to vector<8x128xf32>
    %47 = arith.mulf %46, %45 : vector<8x128xf32>
    %48 = arith.addf %31, %36 : vector<8x128xf32>
    %cst_18 = arith.constant 2.000000e+00 : f32
    %49 = vector.broadcast %cst_18 : f32 to vector<8x128xf32>
    %50 = arith.mulf %49, %48 : vector<8x128xf32>
    %51 = arith.addf %28, %30 : vector<8x128xf32>
    %cst_19 = arith.constant 2.000000e+00 : f32
    %52 = vector.broadcast %cst_19 : f32 to vector<8x128xf32>
    %53 = arith.mulf %52, %51 : vector<8x128xf32>
    %cst_20 = arith.constant 1.000000e+00 : f32
    %54 = vector.broadcast %cst_20 : f32 to vector<8x128xf32>
    %55 = arith.subf %54, %53 : vector<8x128xf32>
    %56 = arith.subf %33, %34 : vector<8x128xf32>
    %cst_21 = arith.constant 2.000000e+00 : f32
    %57 = vector.broadcast %cst_21 : f32 to vector<8x128xf32>
    %58 = arith.mulf %57, %56 : vector<8x128xf32>
    %59 = arith.subf %32, %35 : vector<8x128xf32>
    %cst_22 = arith.constant 2.000000e+00 : f32
    %60 = vector.broadcast %cst_22 : f32 to vector<8x128xf32>
    %61 = arith.mulf %60, %59 : vector<8x128xf32>
    %62 = arith.addf %33, %34 : vector<8x128xf32>
    %cst_23 = arith.constant 2.000000e+00 : f32
    %63 = vector.broadcast %cst_23 : f32 to vector<8x128xf32>
    %64 = arith.mulf %63, %62 : vector<8x128xf32>
    %65 = arith.addf %28, %29 : vector<8x128xf32>
    %cst_24 = arith.constant 2.000000e+00 : f32
    %66 = vector.broadcast %cst_24 : f32 to vector<8x128xf32>
    %67 = arith.mulf %66, %65 : vector<8x128xf32>
    %cst_25 = arith.constant 1.000000e+00 : f32
    %68 = vector.broadcast %cst_25 : f32 to vector<8x128xf32>
    %69 = arith.subf %68, %67 : vector<8x128xf32>
    %c0_26 = arith.constant 0 : index
    %c0_27 = arith.constant 0 : index
    %c0_28 = arith.constant 0 : index
    %70 = vector.load %arg2[%c0_26, %c0_27, %c0_28] : memref<16x8x128xf32, #tpu.memory_space<vmem>>, vector<1x8x128xf32>
    %71 = vector.shape_cast %70 : vector<1x8x128xf32> to vector<8x128xf32>
    %72 = vector.shape_cast %41 : vector<8x128xf32> to vector<1x8x128xf32>
    tpu.vector_store %arg2[%c0_26, %c0_27, %c0_28], %72 {strides = array<i32>} : memref<16x8x128xf32, #tpu.memory_space<vmem>>, vector<1x8x128xf32>,
    %c1_29 = arith.constant 1 : index
    %c0_30 = arith.constant 0 : index
    %c0_31 = arith.constant 0 : index
    %73 = vector.load %arg2[%c1_29, %c0_30, %c0_31] : memref<16x8x128xf32, #tpu.memory_space<vmem>>, vector<1x8x128xf32>
    %74 = vector.shape_cast %73 : vector<1x8x128xf32> to vector<8x128xf32>
    %75 = vector.shape_cast %44 : vector<8x128xf32> to vector<1x8x128xf32>
    tpu.vector_store %arg2[%c1_29, %c0_30, %c0_31], %75 {strides = array<i32>} : memref<16x8x128xf32, #tpu.memory_space<vmem>>, vector<1x8x128xf32>,
    %c2_32 = arith.constant 2 : index
    %c0_33 = arith.constant 0 : index
    %c0_34 = arith.constant 0 : index
    %76 = vector.load %arg2[%c2_32, %c0_33, %c0_34] : memref<16x8x128xf32, #tpu.memory_space<vmem>>, vector<1x8x128xf32>
    %77 = vector.shape_cast %76 : vector<1x8x128xf32> to vector<8x128xf32>
    %78 = vector.shape_cast %47 : vector<8x128xf32> to vector<1x8x128xf32>
    tpu.vector_store %arg2[%c2_32, %c0_33, %c0_34], %78 {strides = array<i32>} : memref<16x8x128xf32, #tpu.memory_space<vmem>>, vector<1x8x128xf32>,
    %c3_35 = arith.constant 3 : index
    %c0_36 = arith.constant 0 : index
    %c0_37 = arith.constant 0 : index
    %79 = vector.load %arg2[%c3_35, %c0_36, %c0_37] : memref<16x8x128xf32, #tpu.memory_space<vmem>>, vector<1x8x128xf32>
    %80 = vector.shape_cast %79 : vector<1x8x128xf32> to vector<8x128xf32>
    %81 = vector.shape_cast %9 : vector<8x128xf32> to vector<1x8x128xf32>
    tpu.vector_store %arg2[%c3_35, %c0_36, %c0_37], %81 {strides = array<i32>} : memref<16x8x128xf32, #tpu.memory_space<vmem>>, vector<1x8x128xf32>,
    %c4_38 = arith.constant 4 : index
    %c0_39 = arith.constant 0 : index
    %c0_40 = arith.constant 0 : index
    %82 = vector.load %arg2[%c4_38, %c0_39, %c0_40] : memref<16x8x128xf32, #tpu.memory_space<vmem>>, vector<1x8x128xf32>
    %83 = vector.shape_cast %82 : vector<1x8x128xf32> to vector<8x128xf32>
    %84 = vector.shape_cast %50 : vector<8x128xf32> to vector<1x8x128xf32>
    tpu.vector_store %arg2[%c4_38, %c0_39, %c0_40], %84 {strides = array<i32>} : memref<16x8x128xf32, #tpu.memory_space<vmem>>, vector<1x8x128xf32>,
    %c5_41 = arith.constant 5 : index
    %c0_42 = arith.constant 0 : index
    %c0_43 = arith.constant 0 : index
    %85 = vector.load %arg2[%c5_41, %c0_42, %c0_43] : memref<16x8x128xf32, #tpu.memory_space<vmem>>, vector<1x8x128xf32>
    %86 = vector.shape_cast %85 : vector<1x8x128xf32> to vector<8x128xf32>
    %87 = vector.shape_cast %55 : vector<8x128xf32> to vector<1x8x128xf32>
    tpu.vector_store %arg2[%c5_41, %c0_42, %c0_43], %87 {strides = array<i32>} : memref<16x8x128xf32, #tpu.memory_space<vmem>>, vector<1x8x128xf32>,
    %c6_44 = arith.constant 6 : index
    %c0_45 = arith.constant 0 : index
    %c0_46 = arith.constant 0 : index
    %88 = vector.load %arg2[%c6_44, %c0_45, %c0_46] : memref<16x8x128xf32, #tpu.memory_space<vmem>>, vector<1x8x128xf32>
    %89 = vector.shape_cast %88 : vector<1x8x128xf32> to vector<8x128xf32>
    %90 = vector.shape_cast %58 : vector<8x128xf32> to vector<1x8x128xf32>
    tpu.vector_store %arg2[%c6_44, %c0_45, %c0_46], %90 {strides = array<i32>} : memref<16x8x128xf32, #tpu.memory_space<vmem>>, vector<1x8x128xf32>,
    %c7 = arith.constant 7 : index
    %c0_47 = arith.constant 0 : index
    %c0_48 = arith.constant 0 : index
    %91 = vector.load %arg2[%c7, %c0_47, %c0_48] : memref<16x8x128xf32, #tpu.memory_space<vmem>>, vector<1x8x128xf32>
    %92 = vector.shape_cast %91 : vector<1x8x128xf32> to vector<8x128xf32>
    %93 = vector.shape_cast %11 : vector<8x128xf32> to vector<1x8x128xf32>
    tpu.vector_store %arg2[%c7, %c0_47, %c0_48], %93 {strides = array<i32>} : memref<16x8x128xf32, #tpu.memory_space<vmem>>, vector<1x8x128xf32>,
    %c8 = arith.constant 8 : index
    %c0_49 = arith.constant 0 : index
    %c0_50 = arith.constant 0 : index
    %94 = vector.load %arg2[%c8, %c0_49, %c0_50] : memref<16x8x128xf32, #tpu.memory_space<vmem>>, vector<1x8x128xf32>
    %95 = vector.shape_cast %94 : vector<1x8x128xf32> to vector<8x128xf32>
    %96 = vector.shape_cast %61 : vector<8x128xf32> to vector<1x8x128xf32>
    tpu.vector_store %arg2[%c8, %c0_49, %c0_50], %96 {strides = array<i32>} : memref<16x8x128xf32, #tpu.memory_space<vmem>>, vector<1x8x128xf32>,
    %c9 = arith.constant 9 : index
    %c0_51 = arith.constant 0 : index
    %c0_52 = arith.constant 0 : index
    %97 = vector.load %arg2[%c9, %c0_51, %c0_52] : memref<16x8x128xf32, #tpu.memory_space<vmem>>, vector<1x8x128xf32>
    %98 = vector.shape_cast %97 : vector<1x8x128xf32> to vector<8x128xf32>
    %99 = vector.shape_cast %64 : vector<8x128xf32> to vector<1x8x128xf32>
    tpu.vector_store %arg2[%c9, %c0_51, %c0_52], %99 {strides = array<i32>} : memref<16x8x128xf32, #tpu.memory_space<vmem>>, vector<1x8x128xf32>,
    %c10 = arith.constant 10 : index
    %c0_53 = arith.constant 0 : index
    %c0_54 = arith.constant 0 : index
    %100 = vector.load %arg2[%c10, %c0_53, %c0_54] : memref<16x8x128xf32, #tpu.memory_space<vmem>>, vector<1x8x128xf32>
    %101 = vector.shape_cast %100 : vector<1x8x128xf32> to vector<8x128xf32>
    %102 = vector.shape_cast %69 : vector<8x128xf32> to vector<1x8x128xf32>
    tpu.vector_store %arg2[%c10, %c0_53, %c0_54], %102 {strides = array<i32>} : memref<16x8x128xf32, #tpu.memory_space<vmem>>, vector<1x8x128xf32>,
    %c11 = arith.constant 11 : index
    %c0_55 = arith.constant 0 : index
    %c0_56 = arith.constant 0 : index
    %103 = vector.load %arg2[%c11, %c0_55, %c0_56] : memref<16x8x128xf32, #tpu.memory_space<vmem>>, vector<1x8x128xf32>
    %104 = vector.shape_cast %103 : vector<1x8x128xf32> to vector<8x128xf32>
    %105 = vector.shape_cast %13 : vector<8x128xf32> to vector<1x8x128xf32>
    tpu.vector_store %arg2[%c11, %c0_55, %c0_56], %105 {strides = array<i32>} : memref<16x8x128xf32, #tpu.memory_space<vmem>>, vector<1x8x128xf32>,
    %cst_57 = arith.constant 0.000000e+00 : f32
    %106 = vector.broadcast %cst_57 : f32 to vector<8x128xf32>
    %c12 = arith.constant 12 : index
    %c0_58 = arith.constant 0 : index
    %c0_59 = arith.constant 0 : index
    %107 = vector.load %arg2[%c12, %c0_58, %c0_59] : memref<16x8x128xf32, #tpu.memory_space<vmem>>, vector<1x8x128xf32>
    %108 = vector.shape_cast %107 : vector<1x8x128xf32> to vector<8x128xf32>
    %109 = vector.shape_cast %106 : vector<8x128xf32> to vector<1x8x128xf32>
    tpu.vector_store %arg2[%c12, %c0_58, %c0_59], %109 {strides = array<i32>} : memref<16x8x128xf32, #tpu.memory_space<vmem>>, vector<1x8x128xf32>,
    %c13 = arith.constant 13 : index
    %c0_60 = arith.constant 0 : index
    %c0_61 = arith.constant 0 : index
    %110 = vector.load %arg2[%c13, %c0_60, %c0_61] : memref<16x8x128xf32, #tpu.memory_space<vmem>>, vector<1x8x128xf32>
    %111 = vector.shape_cast %110 : vector<1x8x128xf32> to vector<8x128xf32>
    %112 = vector.shape_cast %106 : vector<8x128xf32> to vector<1x8x128xf32>
    tpu.vector_store %arg2[%c13, %c0_60, %c0_61], %112 {strides = array<i32>} : memref<16x8x128xf32, #tpu.memory_space<vmem>>, vector<1x8x128xf32>,
    %c14 = arith.constant 14 : index
    %c0_62 = arith.constant 0 : index
    %c0_63 = arith.constant 0 : index
    %113 = vector.load %arg2[%c14, %c0_62, %c0_63] : memref<16x8x128xf32, #tpu.memory_space<vmem>>, vector<1x8x128xf32>
    %114 = vector.shape_cast %113 : vector<1x8x128xf32> to vector<8x128xf32>
    %115 = vector.shape_cast %106 : vector<8x128xf32> to vector<1x8x128xf32>
    tpu.vector_store %arg2[%c14, %c0_62, %c0_63], %115 {strides = array<i32>} : memref<16x8x128xf32, #tpu.memory_space<vmem>>, vector<1x8x128xf32>,
    %cst_64 = arith.constant 1.000000e+00 : f32
    %116 = vector.broadcast %cst_64 : f32 to vector<8x128xf32>
    %c15 = arith.constant 15 : index
    %c0_65 = arith.constant 0 : index
    %c0_66 = arith.constant 0 : index
    %117 = vector.load %arg2[%c15, %c0_65, %c0_66] : memref<16x8x128xf32, #tpu.memory_space<vmem>>, vector<1x8x128xf32>
    %118 = vector.shape_cast %117 : vector<1x8x128xf32> to vector<8x128xf32>
    %119 = vector.shape_cast %116 : vector<8x128xf32> to vector<1x8x128xf32>
    tpu.vector_store %arg2[%c15, %c0_65, %c0_66], %119 {strides = array<i32>} : memref<16x8x128xf32, #tpu.memory_space<vmem>>, vector<1x8x128xf32>,
    return
  }
  func.func @transform_0(%arg0: i32) -> (i32, i32, i32) {
    %c0_i32 = arith.constant 0 : i32
    %c0_i32_0 = arith.constant 0 : i32
    %c0_i32_1 = arith.constant 0 : i32
    return %c0_i32, %arg0, %c0_i32_0 : i32, i32, i32
  }
  func.func @transform_1(%arg0: i32) -> (i32, i32, i32) {
    %c0_i32 = arith.constant 0 : i32
    %c0_i32_0 = arith.constant 0 : i32
    %c0_i32_1 = arith.constant 0 : i32
    return %c0_i32, %arg0, %c0_i32_0 : i32, i32, i32
  }
}

</mosaic_0001>

<bundles_post_ra>
// kernel: tpu_custom_call.1
= control target key start
LH: loop header
LB: loop body
LE: loop exit
PB: predicated region body
PF: predicated region fallthrough
CT: control target
= control target key end

     0   :  { %6 = vsyncpa [#allocation3], 0  ;;  %s228_s0 = inlined_call_operand.hbm [shape: f32[7,8,128], index: 0, kind: input, shape index: {}]   ;;  %s229_s1 = inlined_call_operand.hbm [shape: f32[16,8,128], index: 1, kind: output, shape index: {}]  }
   0x1   :  { %7 = vsyncpa [#allocation4], 0  ;;  %s12_s8 = sshll.u32 %s228_s0, 4  ;;  %s200_s9 = smov [#allocation2]   ;;  %s13_s8 = int_to_ptr.hbm [resolvable:$true] %s12_s8 }
   0x2   :  { %s14_s10 = sshll.u32 %s200_s9, 4  ;;  %s201_s11 = smov 128   ;;  %s15_s10 = int_to_ptr.vmem [resolvable:$true] %s14_s10 }
   0x3   :  { %s202_s12 = smov 8  }
   0x4   :  { %20 = dma.hbm_to_vmem [thread:$0]  %s13_s8, 896, %s15_s10, [#allocation3], %s201_s11, %s201_s11, %s202_s12  }
   0x5   :  { %196 = dma.done.wait [#allocation3], 896  }
   0x6   :  { %197 = vsyncadd [#allocation3], 4294966400  ;;  %v25_v0 = vld [vmem:[#allocation2] sm:$0xff]  ;;  %v27_v1 = vld [vmem:[#allocation2 + $0x8] sm:$0xff]  ;;  %v203_v15 = vmov 0.0   ;;  %v204_v17 = vmov 1.0  }
   0x7   :  { %v29_v2 = vld [vmem:[#allocation2 + $0x10] sm:$0xff]  ;;  %v31_v3 = vld [vmem:[#allocation2 + $0x18] sm:$0xff]  ;;  %v38_v4 = vmul.f32 %v25_v0, %v25_v0  ;;  %v39_v5 = vmul.f32 %v27_v1, %v27_v1  ;;  %v33_v10 = vld [vmem:[#allocation2 + $0x20] sm:$0xff]  ;;  %114 = vst [vmem:[#allocation5 + $0x60] sm:$0xff] %v203_v15  ;;  %s205_s0 = smov [#allocation5]   ;;  %s127_s16 = sshll.u32 %s229_s1, 4  ;;  %s128_s16 = int_to_ptr.hbm [resolvable:$true] %s127_s16 }
   0x8   :  { %v41_v6 = vmul.f32 %v29_v2, %v29_v2  ;;  %v43_v8 = vmul.f32 %v31_v3, %v31_v3  ;;  %96 = vst [vmem:[#allocation5 + $0x18] sm:$0xff] %v33_v10  ;;  %v35_v13 = vld [vmem:[#allocation2 + $0x28] sm:$0xff]  ;;  %v37_v14 = vld [vmem:[#allocation2 + $0x30] sm:$0xff]  ;;  %s125_s13 = sshll.u32 %s205_s0, 4  ;;  %s126_s13 = int_to_ptr.vmem [resolvable:$true] %s125_s13 }
   0x9   :  { %v40_v7 = vadd.f32 %v39_v5, %v38_v4  ;;  %104 = vst [vmem:[#allocation5 + $0x38] sm:$0xff] %v35_v13 }
   0xa   :  { %112 = vst [vmem:[#allocation5 + $0x58] sm:$0xff] %v37_v14 }
   0xb   :  { %v42_v9 = vadd.f32 %v41_v6, %v40_v7  ;;  %116 = vst [vmem:[#allocation5 + $0x68] sm:$0xff] %v203_v15 }
   0xc   :  { %118 = vst [vmem:[#allocation5 + $0x70] sm:$0xff] %v203_v15 }
   0xd   :  { %v44_v11 = vadd.f32 %v43_v8, %v42_v9  ;;  %120 = vst [vmem:[#allocation5 + $0x78] sm:$0xff] %v204_v17 }
   0xf   :  { %v45_v12 = vmax.f32 %v44_v11, 1e-24 }
  0x11   :  { %146 = vrsqrt.f32 %v45_v12  ;;  %vm52_vm0 = vweird.f32 %v45_v12 }
  0x17   :  { %v147_v16 = vpop.eup %146 }
  0x18   :  { %v47_v18 = vmul.f32 %v147_v16, %v45_v12  ;;  %vm53_vm1 = vweird.f32 %v147_v16 }
  0x19   :  { %vm54_vm2 = vmor %vm52_vm0, %vm53_vm1 }
  0x1a   :  { %v48_v19 = vmul.f32 %v147_v16, %v47_v18 }
  0x1c   :  { %v49_v20 = vmul.f32 0.5, %v48_v19 }
  0x1e   :  { %v50_v21 = vsub.f32 1.5, %v49_v20 }
  0x20   :  { %v51_v22 = vmul.f32 %v147_v16, %v50_v21 }
  0x22   :  { %v55_v23 = vsel %vm54_vm2, %v147_v16, %v51_v22 }
  0x23   :  { %v57_v24 = vmul.f32 %v55_v23, %v27_v1  ;;  %v58_v25 = vmul.f32 %v55_v23, %v29_v2  ;;  %v56_v26 = vmul.f32 %v55_v23, %v25_v0  ;;  %v59_v27 = vmul.f32 %v55_v23, %v31_v3 }
  0x25   :  { %v61_v28 = vmul.f32 %v57_v24, %v57_v24  ;;  %v62_v29 = vmul.f32 %v58_v25, %v58_v25  ;;  %v63_v30 = vmul.f32 %v57_v24, %v56_v26  ;;  %v68_v31 = vmul.f32 %v59_v27, %v58_v25 }
  0x26   :  { %v64_v32 = vmul.f32 %v58_v25, %v56_v26  ;;  %v67_v33 = vmul.f32 %v59_v27, %v57_v24  ;;  %v60_v34 = vmul.f32 %v56_v26, %v56_v26  ;;  %v65_v35 = vmul.f32 %v58_v25, %v57_v24 }
  0x27   :  { %v69_v36 = vadd.f32 %v62_v29, %v61_v28  ;;  %v72_v37 = vsub.f32 %v63_v30, %v68_v31  ;;  %v76_v38 = vadd.f32 %v68_v31, %v63_v30  ;;  %v66_v39 = vmul.f32 %v59_v27, %v56_v26 }
  0x28   :  { %v74_v40 = vadd.f32 %v67_v33, %v64_v32  ;;  %v78_v41 = vadd.f32 %v62_v29, %v60_v34  ;;  %v87_v42 = vadd.f32 %v61_v28, %v60_v34  ;;  %v83_v46 = vsub.f32 %v64_v32, %v67_v33 }
  0x29   :  { %v70_v43 = vmul.f32 2.0, %v69_v36  ;;  %v73_v44 = vmul.f32 2.0, %v72_v37  ;;  %v81_v45 = vsub.f32 %v65_v35, %v66_v39  ;;  %v77_v48 = vmul.f32 2.0, %v76_v38 }
  0x2a   :  { %v75_v47 = vmul.f32 2.0, %v74_v40  ;;  %v79_v49 = vmul.f32 2.0, %v78_v41  ;;  %v85_v50 = vadd.f32 %v66_v39, %v65_v35  ;;  %v88_v52 = vmul.f32 2.0, %v87_v42 }
  0x2b   :  { %v71_v51 = vsub.f32 1.0, %v70_v43  ;;  %92 = vst [vmem:[#allocation5 + $0x8] sm:$0xff] %v73_v44  ;;  %v82_v54 = vmul.f32 2.0, %v81_v45  ;;  %v84_v55 = vmul.f32 2.0, %v83_v46 }
  0x2c   :  { %94 = vst [vmem:[#allocation5 + $0x10] sm:$0xff] %v75_v47  ;;  %v80_v53 = vsub.f32 1.0, %v79_v49  ;;  %v86_v56 = vmul.f32 2.0, %v85_v50  ;;  %v89_v57 = vsub.f32 1.0, %v88_v52 }
  0x2d   :  { %90 = vst [vmem:[#allocation5] sm:$0xff] %v71_v51 }
  0x2e   :  { %98 = vst [vmem:[#allocation5 + $0x20] sm:$0xff] %v77_v48 }
  0x2f   :  { %100 = vst [vmem:[#allocation5 + $0x28] sm:$0xff] %v80_v53 }
  0x30   :  { %102 = vst [vmem:[#allocation5 + $0x30] sm:$0xff] %v82_v54 }
  0x31   :  { %106 = vst [vmem:[#allocation5 + $0x40] sm:$0xff] %v84_v55 }
  0x32   :  { %108 = vst [vmem:[#allocation5 + $0x48] sm:$0xff] %v86_v56 }
  0x33   :  { %110 = vst [vmem:[#allocation5 + $0x50] sm:$0xff] %v89_v57 }
  0x34   :  { %133 = dma.vmem_to_hbm [thread:$0]  %s126_s13, 2048, %s128_s16, [#allocation4], %s201_s11, %s201_s11, %s202_s12  }
  0x35   :  { %198 = dma.done.wait [#allocation4], 2048  }
  0x36   :  { %199 = vsyncadd [#allocation4], 4294965248 }
  0x37   :  { %138 = vsyncpa [#allocation3], 1 }
  0x38   :  { %139 = vsyncpa [#allocation4], 1 }

</bundles_post_ra>
